<compile_context>
chip_gen: v5e
topology: v5e:2x2
jax: 0.10.0
libtpu: 0.0.40
codegen_flags: <defaults>
</compile_context>

<pallas_src>
import math

import jax
import jax.numpy as jnp
from jax.experimental import pallas as pl
from jax.experimental.pallas import tpu as pltpu

LANE = 128
_SUBLANE = {4: 8, 2: 16, 1: 32}  # sublane packing multiple per itemsize


def _dynamic_tanh_kernel(a_ref, w_ref, x_ref, o_ref):
    """One (block_rows, block_cols) tile of y = tanh(alpha * x) * weight.

    a_ref: VMEM (1, 1)            compute dtype (f32, or bf16 on v6e/v7x)
    w_ref: VMEM (1, block_cols)   compute dtype, broadcast over rows
    x_ref/o_ref: VMEM (block_rows, block_cols) in the I/O dtype
    """
    cdt = w_ref.dtype
    x = x_ref[...].astype(cdt)
    y = jnp.tanh(a_ref[...] * x) * w_ref[...]
    o_ref[...] = y.astype(o_ref.dtype)


def _bf16_compute_ok():
    """bf16 VPU/EUP exist on v6e / v7x; keep the f32 path elsewhere (v5e, v4...)."""
    try:
        kind = jax.devices()[0].device_kind.lower()
    except Exception:
        return False
    return any(tag in kind for tag in ("v6", "v7", "7x"))


def _default_budgets():
    """(tile_bytes, vmem_limit_bytes) derived from the chip's VMEM capacity."""
    try:
        cap = pltpu.get_tpu_info().vmem_capacity_bytes
    except Exception:
        cap = None
    if cap is not None and cap >= (100 << 20):      # v5e / v6e: 128 MiB physical VMEM
        return 8 << 20, 64 << 20
    return 4 << 20, 32 << 20                        # v7x (64 MiB) / unknown: conservative


def dynamic_tanh(x, alpha, weight, *, tile_bytes=None, vmem_limit_bytes=None,
                 max_block_cols=16384):
    """y = tanh(alpha * x) * weight, weight broadcast over the last dim.

    x:      (..., H)    alpha: scalar (shape () or (1,))    weight: (H,)
    """
    orig_shape = x.shape
    H = orig_shape[-1]
    out_dtype = x.dtype
    itemsize = jnp.dtype(out_dtype).itemsize
    sub = _SUBLANE.get(itemsize, 8)

    if tile_bytes is None or vmem_limit_bytes is None:
        d_tile, d_vmem = _default_budgets()
        tile_bytes = d_tile if tile_bytes is None else tile_bytes
        vmem_limit_bytes = d_vmem if vmem_limit_bytes is None else vmem_limit_bytes

    # Compute dtype: bf16 on bf16-capable chips for bf16 inputs, else f32
    # (matches the f32 PyTorch parameter math; kernel is HBM-bound either way).
    if out_dtype == jnp.bfloat16 and _bf16_compute_ok():
        compute_dtype = jnp.bfloat16
    else:
        compute_dtype = jnp.float32

    x2 = x.reshape(-1, H)
    R = x2.shape[0]
    w_row = jnp.asarray(weight, dtype=compute_dtype).reshape(1, H)

    # ---- lane-dense repack: make the last dim a multiple of 128 lanes -------
    # Fold rep = lcm(H,128)/H logical rows into one physical row so every vreg
    # lane is used and stores are unmasked full-width `vst`.  Up to rep-1 rows
    # of zero padding make R divisible by rep; they are sliced off afterwards.
    rep, pad_rows = 1, 0
    if H % LANE != 0:
        rep = math.lcm(H, LANE) // H
        pad_rows = (-R) % rep
        if pad_rows > R:            # padding would more than double the stream
            rep, pad_rows = 1, 0    # keep the (masked-store) narrow fallback
    if rep > 1:
        if pad_rows:
            x2 = jnp.pad(x2, ((0, pad_rows), (0, 0)))
        x2 = x2.reshape((R + pad_rows) // rep, rep * H)
        w_row = jnp.tile(w_row, (1, rep))
    Rr, L = x2.shape

    # ---- column blocking (wide hidden dims) ----------------------------------
    # max_block_cols caps the sublane-padded (8, block_cols) weight block to
    # ~0.5 MiB/buffer so the double-buffered footprint stays within the limit.
    if L % LANE == 0:
        cols_budget = max(LANE, (tile_bytes // (sub * itemsize)) // LANE * LANE)
        block_cols = min(L, max_block_cols, cols_budget)
    else:
        block_cols = L              # full-extent last dim (fallback path only)

    # ---- row blocking: biggest tile within the per-buffer byte budget --------
    rows_budget = max(sub, tile_bytes // (block_cols * itemsize))
    block_rows = min(Rr, rows_budget)
    if block_rows >= Rr and Rr * L * itemsize > (2 << 20):
        # Megacore (v7x: 2 TensorCores): split so >= 2 "parallel" row blocks
        # share the HBM stream even when the whole tensor fits one tile.
        block_rows = min(Rr, ((pl.cdiv(Rr, 2) + sub - 1) // sub) * sub)
    elif block_rows < Rr:
        block_rows = max(sub, (block_rows // sub) * sub)

    # Columns OUTER, rows inner: the weight block index (0, j) is constant
    # along the inner axis, so it is DMA'd once per column block.
    grid = (pl.cdiv(L, block_cols), pl.cdiv(Rr, block_rows))

    alpha_arr = jnp.asarray(alpha, dtype=compute_dtype).reshape(1, 1)

    out = pl.pallas_call(
        _dynamic_tanh_kernel,
        out_shape=jax.ShapeDtypeStruct((Rr, L), out_dtype),
        grid_spec=pltpu.PrefetchScalarGridSpec(
            num_scalar_prefetch=0,
            grid=grid,
            in_specs=[
                pl.BlockSpec((1, 1), lambda j, i: (0, 0)),                     # alpha
                pl.BlockSpec((1, block_cols), lambda j, i: (0, j)),            # weight row
                pl.BlockSpec((block_rows, block_cols), lambda j, i: (i, j)),   # x tile
            ],
            out_specs=pl.BlockSpec((block_rows, block_cols), lambda j, i: (i, j)),
        ),
        compiler_params=pltpu.CompilerParams(
            dimension_semantics=("parallel", "parallel"),
            vmem_limit_bytes=vmem_limit_bytes,
        ),
    )(alpha_arr, w_row, x2)

    if rep > 1:
        out = out.reshape(R + pad_rows, H)[:R]
    return out.reshape(orig_shape)


if __name__ == "__main__":
    # Module params (deterministic init, matching nn.Module __init__):
    hidden = 32
    alpha_init_value = 0.5
    alpha = jnp.full((1,), alpha_init_value, dtype=jnp.float32)  # torch.ones(1)*0.5
    weight = jnp.ones((hidden,), dtype=jnp.float32)              # torch.ones(hidden)

    def ref(x, a, w):
        return jnp.tanh(a * x.astype(jnp.float32)) * jnp.asarray(w, jnp.float32)

    # 1) (batch=2, seq=8, hidden=32) f32 -> lane-dense repack, rep=4, no padding.
    x1 = jax.random.normal(jax.random.PRNGKey(0), (2, 8, hidden), dtype=jnp.float32)
    y1 = jax.block_until_ready(dynamic_tanh(x1, alpha, weight))
    assert y1.shape == x1.shape
    assert jnp.allclose(y1, ref(x1, alpha[0], weight), atol=1e-6, rtol=1e-6)

    # 2) hidden=96 (does not divide 128) -> lcm repack (384 lanes) + 1 padded row.
    h2 = 96
    x2 = jax.random.normal(jax.random.PRNGKey(1), (3, 5, h2), dtype=jnp.float32)
    w2 = jnp.linspace(0.5, 1.5, h2, dtype=jnp.float32)
    y2 = jax.block_until_ready(dynamic_tanh(x2, alpha, w2))
    assert jnp.allclose(y2, ref(x2, alpha[0], w2), atol=1e-6, rtol=1e-6)

    # 3) hidden=256, rows not a tile multiple -> ragged last row block via pl.cdiv.
    h3 = 256
    x3 = jax.random.normal(jax.random.PRNGKey(2), (3, 5, h3), dtype=jnp.float32)
    w3 = jnp.linspace(0.5, 1.5, h3, dtype=jnp.float32)
    y3 = jax.block_until_ready(dynamic_tanh(x3, alpha, w3, tile_bytes=8 * 1024))
    assert jnp.allclose(y3, ref(x3, alpha[0], w3), atol=1e-6, rtol=1e-6)

    # 4) hidden=512 with a tiny tile budget -> column-blocked path
    #    (cols-outer grid, weight resident across the inner row sweep).
    h4 = 512
    x4 = jax.random.normal(jax.random.PRNGKey(3), (2, 4, h4), dtype=jnp.float32)
    w4 = jnp.linspace(0.5, 1.5, h4, dtype=jnp.float32)
    y4 = jax.block_until_ready(dynamic_tanh(x4, alpha, w4, tile_bytes=4 * 1024))
    assert jnp.allclose(y4, ref(x4, alpha[0], w4), atol=1e-6, rtol=1e-6)

    # 5) bf16 input: bf16 compute on v6e/v7x, f32 compute on v5e; loose tolerance
    #    covers the bf16-rounding difference vs. the f32 reference.
    xb = x1.astype(jnp.bfloat16)
    wb = jnp.linspace(0.5, 1.5, hidden, dtype=jnp.float32)
    yb = jax.block_until_ready(dynamic_tanh(xb, alpha, wb))
    yb_ref = ref(xb, alpha[0], wb)
    assert jnp.allclose(yb.astype(jnp.float32), yb_ref, atol=3e-2, rtol=0.0)

    print("KERNEL_OK")
</pallas_src>

<mosaic_0001>
module attributes {stable_mosaic.version = 11 : i64} {
  func.func @_dynamic_tanh_kernel(%arg0: i32, %arg1: i32, %arg2: memref<1x1xf32, #tpu.memory_space<vmem>>, %arg3: memref<1x128xf32, #tpu.memory_space<vmem>>, %arg4: memref<4x128xf32, #tpu.memory_space<vmem>>, %arg5: memref<4x128xf32, #tpu.memory_space<vmem>>) attributes {dimension_semantics = [#tpu.dimension_semantics<parallel>, #tpu.dimension_semantics<parallel>], iteration_bounds = array<i64: 1, 1>, scalar_prefetch = 0 : i64, scratch_operands = 0 : i64, tpu.core_type = #tpu.core_type<tc>, window_params = [{pipeline_mode = #tpu.pipeline_mode<synchronous>, transform_indices = @transform_0, window_bounds = array<i64: 1, 1>}, {transform_indices = @transform_1, window_bounds = array<i64: 1, 128>}, {transform_indices = @transform_2, window_bounds = array<i64: 4, 128>}, {transform_indices = @transform_3, window_bounds = array<i64: 4, 128>}]} {
    %c0 = arith.constant 0 : index
    %c0_0 = arith.constant 0 : index
    %0 = vector.load %arg4[%c0, %c0_0] : memref<4x128xf32, #tpu.memory_space<vmem>>, vector<4x128xf32>
    %c0_1 = arith.constant 0 : index
    %c0_2 = arith.constant 0 : index
    %1 = vector.load %arg2[%c0_1, %c0_2] : memref<1x1xf32, #tpu.memory_space<vmem>>, vector<1x1xf32>
    %2 = vector.broadcast %1 : vector<1x1xf32> to vector<4x128xf32>
    %3 = arith.mulf %2, %0 : vector<4x128xf32>
    %4 = math.tanh %3 : vector<4x128xf32>
    %c0_3 = arith.constant 0 : index
    %c0_4 = arith.constant 0 : index
    %5 = vector.load %arg3[%c0_3, %c0_4] : memref<1x128xf32, #tpu.memory_space<vmem>>, vector<1x128xf32>
    %6 = vector.broadcast %5 : vector<1x128xf32> to vector<4x128xf32>
    %7 = arith.mulf %4, %6 : vector<4x128xf32>
    %c0_5 = arith.constant 0 : index
    %c0_6 = arith.constant 0 : index
    %8 = vector.load %arg5[%c0_5, %c0_6] : memref<4x128xf32, #tpu.memory_space<vmem>>, vector<4x128xf32>
    tpu.vector_store %arg5[%c0_5, %c0_6], %7 {strides = array<i32>} : memref<4x128xf32, #tpu.memory_space<vmem>>, vector<4x128xf32>,
    return
  }
  func.func @transform_0(%arg0: i32, %arg1: i32) -> (i32, i32) {
    %c0_i32 = arith.constant 0 : i32
    %c0_i32_0 = arith.constant 0 : i32
    %c0_i32_1 = arith.constant 0 : i32
    return %c0_i32, %c0_i32_0 : i32, i32
  }
  func.func @transform_1(%arg0: i32, %arg1: i32) -> (i32, i32) {
    %c0_i32 = arith.constant 0 : i32
    %c0_i32_0 = arith.constant 0 : i32
    return %c0_i32, %arg0 : i32, i32
  }
  func.func @transform_2(%arg0: i32, %arg1: i32) -> (i32, i32) {
    %c0_i32 = arith.constant 0 : i32
    return %arg1, %arg0 : i32, i32
  }
  func.func @transform_3(%arg0: i32, %arg1: i32) -> (i32, i32) {
    %c0_i32 = arith.constant 0 : i32
    return %arg1, %arg0 : i32, i32
  }
}

</mosaic_0001>

<bundles_post_ra>
// kernel: tpu_custom_call.1
= control target key start
LH: loop header
LB: loop body
LE: loop exit
PB: predicated region body
PF: predicated region fallthrough
CT: control target
= control target key end

     0   :  { %s159_s0 = inlined_call_operand.<no memory space> [shape: f32[1,1], index: 0, kind: input, shape index: {}]   ;;  %s160_s1 = inlined_call_operand.vmem [shape: f32[1,128], index: 1, kind: input, shape index: {}]   ;;  %s161_s2 = inlined_call_operand.hbm [shape: f32[4,128], index: 2, kind: input, shape index: {}]   ;;  %s162_s3 = inlined_call_operand.hbm [shape: f32[4,128], index: 3, kind: output, shape index: {}]  }
   0x1   :  { %v8_v0 = vstv %s159_s0 }
   0x2   :  { %9 = vst [vmem:[#allocation2] sm:$0x1] %v8_v0 }
   0x3   :  { %10 = vsyncpa [#allocation4], 0 }
   0x4   :  { %11 = vsyncpa [#allocation5], 0  ;;  %s21_s16 = sshll.u32 %s161_s2, 4  ;;  %s124_s17 = smov [#allocation3]   ;;  %s22_s16 = int_to_ptr.hbm [resolvable:$true] %s21_s16 }
   0x5   :  { %s23_s18 = sshll.u32 %s124_s17, 4  ;;  %s24_s18 = int_to_ptr.vmem [resolvable:$true] %s23_s18 }
   0x6   :  { %26 = dma.hbm_to_vmem [thread:$0]  %s22_s16, 64, %s24_s18, [#allocation4]  }
   0x7   :  { %120 = dma.done.wait [#allocation4], 64  }
   0x8   :  { %121 = vsyncadd [#allocation4], 4294967232  ;;  %v125_v1 = vmov 0   ;;  %v31_v3 = vld [vmem:[#allocation3] sm:$0xf]  ;;  %s126_s2 = smov [#allocation6]  }
   0x9   :  { %67 = vset.pattern.permute.xlu0 %v125_v1  ;;  %v68_v2 = vld [vmem:[#allocation2] ss:$0 sm:$0xff]  ;;  %s52_s20 = sshll.u32 %s126_s2, 4  ;;  %s54_s23 = sshll.u32 %s162_s3, 4  ;;  %s53_s20 = int_to_ptr.vmem [resolvable:$true] %s52_s20  ;;  %s55_s23 = int_to_ptr.hbm [resolvable:$true] %s54_s23 }
   0xa   :  { %36 = vperm.xlu0 %67, %v68_v2   ;;  %v69_v6 = vld [vmem:[%s160_s1] ss:$0 sm:$0xff] }
  0x7c   :  { %v37_v4 = vpop.permute.xlu0 %36 }
  0x7d   :  { %v39_v5 = vmul.f32 %v37_v4, %v31_v3 }
  0x7f   :  { %70 = vtanh.f32 %v39_v5 }
  0x85   :  { %v71_v7 = vpop.eup %70 }
  0x86   :  { %v45_v8 = vmul.f32 %v71_v7, %v69_v6 }
  0x88   :  { %46 = vst [vmem:[#allocation6] sm:$0xf] %v45_v8 }
  0x89   :  { %57 = dma.vmem_to_hbm [thread:$0]  %s53_s20, 64, %s55_s23, [#allocation5]  }
  0x8a   :  { %122 = dma.done.wait [#allocation5], 64  }
  0x8b   :  { %123 = vsyncadd [#allocation5], 4294967232 }
  0x8c   :  { %62 = vsyncpa [#allocation4], 1 }
  0x8d   :  { %63 = vsyncpa [#allocation5], 1 }

</bundles_post_ra>
